<compile_context>
chip_gen: v7x
topology: tpu7x:2x2x1
jax: 0.10.0
libtpu: 0.0.40
codegen_flags: <defaults>
</compile_context>

<pallas_src>
import functools

import jax
import jax.numpy as jnp
from jax.experimental import pallas as pl
from jax.experimental.pallas import tpu as pltpu


# --------------------------------------------------------------------------
# Generation-aware VMEM budgets
# --------------------------------------------------------------------------

def _vmem_capacity_bytes():
    try:
        info = pltpu.get_tpu_info()
        cap = int(getattr(info, "vmem_capacity_bytes", 0) or 0)
        if cap > 0:
            return min(max(cap, 32 << 20), 256 << 20)
    except Exception:
        pass
    return 64 << 20   # conservative: v7x per-TensorCore VMEM


def _budgets(weight_bytes):
    cap = _vmem_capacity_bytes()
    # Keep the pallas_call's scoped-VMEM request well under physical capacity
    # so weights + compiler scratch + double-buffered slabs all fit:
    # 48 MiB on v7x (64 MiB VMEM), 96 MiB on v5e/v6e (128 MiB VMEM).
    limit_cap = int(cap * 0.75)
    # in + out blocks are each double-buffered (4 live block copies) plus the
    # resident weights; ~6-way split keeps blocks near the 4-16 MiB sweet spot.
    block_budget = min(limit_cap // 6, 16 << 20)
    block_budget = min(block_budget,
                       max(1 << 20, (limit_cap - 2 * weight_bytes) // 4))
    block_budget = max(block_budget, 1 << 20)
    return limit_cap, block_budget


def _vmem_limit(block_bytes_list, weight_bytes, limit_cap):
    need = 2 * sum(block_bytes_list) + 2 * weight_bytes   # double-buffered
    need = int(need * 1.2) + (2 << 20)                    # compiler headroom
    return int(max(8 << 20, min(need, limit_cap)))


def _pick_bt(batch, bytes_per_sample, block_budget):
    """Largest Bt fitting the block budget, capped so the grid has >= 2 steps
    (lets the 'parallel' batch axis shard across v7x's 2 TensorCores)."""
    bt = max(1, block_budget // bytes_per_sample)
    if batch >= 2:
        bt = min(bt, -(-batch // 2))   # ceil(batch / 2)  ->  grid >= 2
    return int(min(bt, batch))


# --------------------------------------------------------------------------
# Fused single-pass kernel (default path)
# --------------------------------------------------------------------------

def _ca_fused_kernel(x_ref, w1t_ref, w2t_ref, o_ref, *, inv_hw, do_residual,
                     channels_last):
    # NCHW layout:          x_ref (Bt, C, HW)  -> reduce over lanes (axis 2)
    # channels-last layout: x_ref (Bt, HW, C)  -> reduce over sublanes (axis 1)
    x = x_ref[...]
    bt = x.shape[0]
    red_axis = 1 if channels_last else 2

    # Pooling: sum accumulates in f32; max is exact in the native dtype and
    # only the tiny (Bt, C) result is upcast.
    avg = jnp.sum(x, axis=red_axis, dtype=jnp.float32) * inv_hw      # (Bt, C)
    mx = jnp.max(x, axis=red_axis).astype(jnp.float32)               # (Bt, C)

    # Shared 2-layer MLP, run once on the stacked pooled vectors.
    pooled = jnp.concatenate([avg, mx], axis=0)                      # (2Bt, C)
    h = jnp.maximum(
        jnp.dot(pooled, w1t_ref[...], preferred_element_type=jnp.float32), 0.0)
    z = jnp.dot(h, w2t_ref[...], preferred_element_type=jnp.float32)

    att = jax.nn.sigmoid(z[:bt] + z[bt:])                            # (Bt, C)
    if do_residual:
        att = att + 1.0        # fold residual: x*att + x == x*(att + 1)
    scale = att.astype(x.dtype)

    if channels_last:
        o_ref[...] = x * scale[:, None, :]
    else:
        o_ref[...] = x * scale[:, :, None]


# --------------------------------------------------------------------------
# Two-phase fallback (huge per-sample slabs): pool+MLP kernel, then scale
# --------------------------------------------------------------------------

def _ca_pool_kernel(x_ref, w1t_ref, w2t_ref, scale_ref, sum_sc, max_sc, *,
                    inv_hw, do_residual, hw_total, hw_tile, need_mask):
    hw = pl.program_id(1)
    x = x_ref[...]                                   # (1, C, hw_tile)

    if need_mask:
        lane = jax.lax.broadcasted_iota(jnp.int32, x.shape, dimension=2)
        valid = (hw * hw_tile + lane) < hw_total
        xs = jnp.where(valid, x, jnp.zeros_like(x))
        xm = jnp.where(valid, x, jnp.full_like(x, -jnp.inf))
    else:
        xs = x
        xm = x

    psum = jnp.sum(xs, axis=-1, dtype=jnp.float32)            # (1, C)
    pmax = jnp.max(xm, axis=-1).astype(jnp.float32)           # (1, C)

    @pl.when(hw == 0)
    def _():
        sum_sc[...] = jnp.zeros_like(sum_sc)
        max_sc[...] = jnp.full_like(max_sc, -jnp.inf)

    sum_sc[...] = sum_sc[...] + psum
    max_sc[...] = jnp.maximum(max_sc[...], pmax)

    @pl.when(hw == pl.num_programs(1) - 1)
    def _():
        pooled = jnp.concatenate([sum_sc[...] * inv_hw, max_sc[...]], axis=0)
        h = jnp.maximum(
            jnp.dot(pooled, w1t_ref[...],
                    preferred_element_type=jnp.float32), 0.0)
        z = jnp.dot(h, w2t_ref[...], preferred_element_type=jnp.float32)
        att = jax.nn.sigmoid(z[:1] + z[1:])                   # (1, C)
        if do_residual:
            att = att + 1.0
        scale_ref[...] = att[:, :, None].astype(scale_ref.dtype)   # (1, C, 1)


def _ca_scale_kernel(x_ref, scale_ref, o_ref):
    x = x_ref[...]                                   # (1, C, hw_tile)
    s = scale_ref[...].astype(x.dtype)               # (1, C, 1)
    o_ref[...] = x * s


def _ca_two_phase(x_flat, w1t, w2t, *, do_residual, block_budget, limit_cap):
    # TODO(synk): fallback keeps NCHW layout (huge slabs imply large, already
    # lane-dense HW); a channels-last fallback variant is not implemented.
    B, C, HW = x_flat.shape
    hidden = w1t.shape[1]
    itemsize = x_flat.dtype.itemsize
    weight_bytes = (w1t.size + w2t.size) * w1t.dtype.itemsize

    lanes = (block_budget // (C * itemsize)) // 128 * 128
    hw_tile = int(min(max(128, lanes), HW))
    n_hw = int(pl.cdiv(HW, hw_tile))
    need_mask = (HW % hw_tile) != 0

    blk_bytes = C * hw_tile * itemsize
    scale_bytes = C * 4

    pool_kernel = functools.partial(
        _ca_pool_kernel, inv_hw=1.0 / HW, do_residual=do_residual,
        hw_total=HW, hw_tile=hw_tile, need_mask=need_mask)

    scale = pl.pallas_call(
        pool_kernel,
        out_shape=jax.ShapeDtypeStruct((B, C, 1), jnp.float32),
        grid_spec=pltpu.PrefetchScalarGridSpec(
            num_scalar_prefetch=0,
            grid=(B, n_hw),
            in_specs=[
                pl.BlockSpec((1, C, hw_tile), lambda b, h: (b, 0, h)),
                pl.BlockSpec((C, hidden), lambda b, h: (0, 0)),
                pl.BlockSpec((hidden, C), lambda b, h: (0, 0)),
            ],
            out_specs=pl.BlockSpec((1, C, 1), lambda b, h: (b, 0, 0)),
            scratch_shapes=[pltpu.VMEM((1, C), jnp.float32),
                            pltpu.VMEM((1, C), jnp.float32)],
        ),
        compiler_params=pltpu.CompilerParams(
            dimension_semantics=("parallel", "arbitrary"),
            vmem_limit_bytes=_vmem_limit([blk_bytes, scale_bytes],
                                         weight_bytes, limit_cap),
        ),
    )(x_flat, w1t, w2t)

    out_flat = pl.pallas_call(
        _ca_scale_kernel,
        out_shape=jax.ShapeDtypeStruct((B, C, HW), x_flat.dtype),
        grid_spec=pltpu.PrefetchScalarGridSpec(
            num_scalar_prefetch=0,
            grid=(B, n_hw),
            in_specs=[
                pl.BlockSpec((1, C, hw_tile), lambda b, h: (b, 0, h)),
                pl.BlockSpec((1, C, 1), lambda b, h: (b, 0, 0)),
            ],
            out_specs=pl.BlockSpec((1, C, hw_tile), lambda b, h: (b, 0, h)),
        ),
        input_output_aliases={0: 0},
        compiler_params=pltpu.CompilerParams(
            dimension_semantics=("parallel", "arbitrary"),
            vmem_limit_bytes=_vmem_limit([blk_bytes, blk_bytes, scale_bytes],
                                         0, limit_cap),
        ),
    )(x_flat, scale)
    return out_flat


# --------------------------------------------------------------------------
# Public wrapper
# --------------------------------------------------------------------------

@functools.partial(jax.jit, static_argnames=("do_residual", "block_budget_bytes"))
def ca_block(x, w1, w2, *, do_residual=False, block_budget_bytes=None):
    """x: (B, C, H, W); w1: (C//r, C); w2: (C, C//r).  Matches CABlock.forward."""
    B, C, H, W = x.shape
    HW = H * W
    hidden = w1.shape[0]
    itemsize = x.dtype.itemsize

    # Hoist the weight transpose AND f32 upcast out of the kernel:
    # pooled (2Bt, C) @ w1t (C, hidden) -> relu -> @ w2t (hidden, C).
    w1t = jnp.transpose(w1).astype(jnp.float32)
    w2t = jnp.transpose(w2).astype(jnp.float32)
    weight_bytes = (w1t.size + w2t.size) * 4

    limit_cap, auto_budget = _budgets(weight_bytes)
    block_budget = int(block_budget_bytes) if block_budget_bytes else auto_budget

    bytes_per_sample = C * HW * itemsize
    x_flat = x.reshape(B, C, HW)

    # Huge per-sample slab: HW-tiled two-phase path keeps blocks in budget.
    if bytes_per_sample > block_budget:
        out_flat = _ca_two_phase(x_flat, w1t, w2t, do_residual=do_residual,
                                 block_budget=block_budget, limit_cap=limit_cap)
        return out_flat.reshape(B, C, H, W)

    # Channels-last path when the spatial axis is not lane-dense but C is:
    # presents C on the lane axis for both loads and stores (unmasked vst).
    # (In a real channels-last pipeline the wrapper transposes disappear.)
    channels_last = (HW % 128 != 0) and (C % 128 == 0)
    if channels_last:
        x_in = jnp.transpose(x_flat, (0, 2, 1))          # (B, HW, C)
        blk_shape = lambda bt: (bt, HW, C)
    else:
        x_in = x_flat                                    # (B, C, HW)
        blk_shape = lambda bt: (bt, C, HW)

    Bt = _pick_bt(B, bytes_per_sample, block_budget)
    nb = int(pl.cdiv(B, Bt))                             # partial last block OK
    block_bytes = Bt * bytes_per_sample
    vmem_limit = _vmem_limit([block_bytes, block_bytes], weight_bytes, limit_cap)

    # TODO(synk): B == 1 still runs on a single TensorCore on v7x; a second
    # parallel grid axis over HW would be needed to use both cores there.

    kernel = functools.partial(_ca_fused_kernel, inv_hw=1.0 / HW,
                               do_residual=do_residual,
                               channels_last=channels_last)

    out = pl.pallas_call(
        kernel,
        out_shape=jax.ShapeDtypeStruct(x_in.shape, x.dtype),
        grid_spec=pltpu.PrefetchScalarGridSpec(
            num_scalar_prefetch=0,
            grid=(nb,),
            in_specs=[
                pl.BlockSpec(blk_shape(Bt), lambda b: (b, 0, 0)),
                pl.BlockSpec((C, hidden), lambda b: (0, 0)),
                pl.BlockSpec((hidden, C), lambda b: (0, 0)),
            ],
            out_specs=pl.BlockSpec(blk_shape(Bt), lambda b: (b, 0, 0)),
        ),
        input_output_aliases={0: 0},
        compiler_params=pltpu.CompilerParams(
            dimension_semantics=("parallel",),
            vmem_limit_bytes=vmem_limit,
        ),
    )(x_in, w1t, w2t)

    if channels_last:
        out = jnp.transpose(out, (0, 2, 1))
    return out.reshape(B, C, H, W)


# --------------------------------------------------------------------------
# Pure-JAX reference (matches the PyTorch forward)
# --------------------------------------------------------------------------

def ca_block_ref(x, w1, w2, *, do_residual=False):
    avg = x.mean(axis=(2, 3))                                    # (B, C)
    mx = x.max(axis=(2, 3))                                      # (B, C)

    def mlp(v):
        return jnp.maximum(v @ w1.T, 0.0) @ w2.T

    att = jax.nn.sigmoid(mlp(avg) + mlp(mx))                     # (B, C)
    out = x * att[:, :, None, None]
    if do_residual:
        out = out + x
    return out


if __name__ == "__main__":
    def run_case(name, B, C, H, W, ratio=16, do_residual=False,
                 block_budget_bytes=None):
        hidden = max(1, C // ratio)
        key = jax.random.PRNGKey(0)
        kx, k1, k2 = jax.random.split(key, 3)
        x = jax.random.normal(kx, (B, C, H, W), dtype=jnp.float32)
        w1 = jax.random.normal(k1, (hidden, C), dtype=jnp.float32) * 0.1
        w2 = jax.random.normal(k2, (C, hidden), dtype=jnp.float32) * 0.1
        out = jax.block_until_ready(
            ca_block(x, w1, w2, do_residual=do_residual,
                     block_budget_bytes=block_budget_bytes))
        ref = ca_block_ref(x, w1, w2, do_residual=do_residual)
        assert out.shape == x.shape, name
        assert jnp.allclose(out, ref, atol=1e-5, rtol=1e-5), name

    # Default fused NCHW path (HW lane-dense).
    run_case("nchw", B=2, C=32, H=16, W=16)
    # Residual folded into the scale.
    run_case("nchw_residual", B=2, C=32, H=16, W=16, do_residual=True)
    # Channels-last path: HW = 49 (not lane-dense), C = 128 on the lane axis.
    run_case("channels_last", B=2, C=128, H=7, W=7)
    # Forced two-phase fallback (tiny budget) with a partial HW tile (mask path).
    run_case("two_phase", B=2, C=32, H=16, W=20, block_budget_bytes=16 << 10)

    print("KERNEL_OK")
</pallas_src>

<mosaic_0001>
module attributes {stable_mosaic.version = 11 : i64} {
  func.func @_ca_fused_kernel(%arg0: i32, %arg1: memref<1x32x256xf32, #tpu.memory_space<vmem>>, %arg2: memref<32x2xf32, #tpu.memory_space<vmem>>, %arg3: memref<2x32xf32, #tpu.memory_space<vmem>>, %arg4: memref<1x32x256xf32, #tpu.memory_space<vmem>>) attributes {dimension_semantics = [#tpu.dimension_semantics<parallel>], iteration_bounds = array<i64: 2>, scalar_prefetch = 0 : i64, scratch_operands = 0 : i64, tpu.core_type = #tpu.core_type<tc>, window_params = [{transform_indices = @transform_0, window_bounds = array<i64: 1, 32, 256>}, {pipeline_mode = #tpu.pipeline_mode<synchronous>, transform_indices = @transform_1, window_bounds = array<i64: 32, 2>}, {pipeline_mode = #tpu.pipeline_mode<synchronous>, transform_indices = @transform_2, window_bounds = array<i64: 2, 32>}, {transform_indices = @transform_3, window_bounds = array<i64: 1, 32, 256>}]} {
    %c0 = arith.constant 0 : index
    %c0_0 = arith.constant 0 : index
    %c0_1 = arith.constant 0 : index
    %0 = vector.load %arg1[%c0, %c0_0, %c0_1] : memref<1x32x256xf32, #tpu.memory_space<vmem>>, vector<1x32x256xf32>
    %cst = arith.constant dense<0.000000e+00> : vector<1x32xf32>
    %1 = vector.multi_reduction <add>, %0, %cst [2] : vector<1x32x256xf32> to vector<1x32xf32>
    %cst_2 = arith.constant 3.906250e-03 : f32
    %2 = vector.broadcast %cst_2 : f32 to vector<1x32xf32>
    %3 = arith.mulf %1, %2 : vector<1x32xf32>
    %cst_3 = arith.constant dense<0xFF800000> : vector<1x32xf32>
    %4 = vector.multi_reduction <maximumf>, %0, %cst_3 [2] : vector<1x32x256xf32> to vector<1x32xf32>
    %5 = tpu.concatenate %3, %4 in 0 : vector<1x32xf32>, vector<1x32xf32> -> vector<2x32xf32>
    %c0_4 = arith.constant 0 : index
    %c0_5 = arith.constant 0 : index
    %6 = vector.load %arg2[%c0_4, %c0_5] : memref<32x2xf32, #tpu.memory_space<vmem>>, vector<32x2xf32>
    %cst_6 = arith.constant dense<0.000000e+00> : vector<2x2xf32>
    %7 = tpu.matmul %5, %6, %cst_6 {dimension_numbers = #tpu.dot_dimension_numbers<[1], [0], [0], [1], [0, 0, 1, 1], [], []>} : vector<2x32xf32>, vector<32x2xf32>, vector<2x2xf32> -> vector<2x2xf32>
    %cst_7 = arith.constant 0.000000e+00 : f32
    %8 = vector.broadcast %cst_7 : f32 to vector<2x2xf32>
    %9 = arith.maximumf %7, %8 : vector<2x2xf32>
    %c0_8 = arith.constant 0 : index
    %c0_9 = arith.constant 0 : index
    %10 = vector.load %arg3[%c0_8, %c0_9] : memref<2x32xf32, #tpu.memory_space<vmem>>, vector<2x32xf32>
    %cst_10 = arith.constant dense<0.000000e+00> : vector<2x32xf32>
    %11 = tpu.matmul %9, %10, %cst_10 {dimension_numbers = #tpu.dot_dimension_numbers<[1], [0], [0], [1], [0, 0, 1, 1], [], []>} : vector<2x2xf32>, vector<2x32xf32>, vector<2x32xf32> -> vector<2x32xf32>
    %12 = vector.extract_strided_slice %11 {offsets = [0, 0], sizes = [1, 32], strides = [1, 1]} : vector<2x32xf32> to vector<1x32xf32>
    %13 = vector.extract_strided_slice %11 {offsets = [1, 0], sizes = [1, 32], strides = [1, 1]} : vector<2x32xf32> to vector<1x32xf32>
    %14 = arith.addf %12, %13 : vector<1x32xf32>
    %15 = arith.negf %14 : vector<1x32xf32>
    %16 = math.exp %15 : vector<1x32xf32>
    %cst_11 = arith.constant 1.000000e+00 : f32
    %17 = vector.broadcast %cst_11 : f32 to vector<1x32xf32>
    %18 = arith.addf %17, %16 : vector<1x32xf32>
    %19 = arith.divf %17, %18 : vector<1x32xf32>
    %20 = vector.shape_cast %19 : vector<1x32xf32> to vector<1x32x1xf32>
    %21 = vector.broadcast %20 : vector<1x32x1xf32> to vector<1x32x256xf32>
    %22 = arith.mulf %0, %21 : vector<1x32x256xf32>
    %c0_12 = arith.constant 0 : index
    %c0_13 = arith.constant 0 : index
    %c0_14 = arith.constant 0 : index
    %23 = vector.load %arg4[%c0_12, %c0_13, %c0_14] : memref<1x32x256xf32, #tpu.memory_space<vmem>>, vector<1x32x256xf32>
    tpu.vector_store %arg4[%c0_12, %c0_13, %c0_14], %22 {strides = array<i32>} : memref<1x32x256xf32, #tpu.memory_space<vmem>>, vector<1x32x256xf32>,
    return
  }
  func.func @transform_0(%arg0: i32) -> (i32, i32, i32) {
    %c0_i32 = arith.constant 0 : i32
    %c0_i32_0 = arith.constant 0 : i32
    %c0_i32_1 = arith.constant 0 : i32
    return %arg0, %c0_i32, %c0_i32_0 : i32, i32, i32
  }
  func.func @transform_1(%arg0: i32) -> (i32, i32) {
    %c0_i32 = arith.constant 0 : i32
    %c0_i32_0 = arith.constant 0 : i32
    %c0_i32_1 = arith.constant 0 : i32
    return %c0_i32, %c0_i32_0 : i32, i32
  }
  func.func @transform_2(%arg0: i32) -> (i32, i32) {
    %c0_i32 = arith.constant 0 : i32
    %c0_i32_0 = arith.constant 0 : i32
    %c0_i32_1 = arith.constant 0 : i32
    return %c0_i32, %c0_i32_0 : i32, i32
  }
  func.func @transform_3(%arg0: i32) -> (i32, i32, i32) {
    %c0_i32 = arith.constant 0 : i32
    %c0_i32_0 = arith.constant 0 : i32
    %c0_i32_1 = arith.constant 0 : i32
    return %arg0, %c0_i32, %c0_i32_0 : i32, i32, i32
  }
}

</mosaic_0001>

<bundles_post_ra>
// kernel: ca_block.1
= control target key start
LH: loop header
LB: loop body
LE: loop exit
PB: predicated region body
PF: predicated region fallthrough
CT: control target
= control target key end

     0   :  { %s615_s12 = smov 0   ;;  %s696_s0 = inlined_call_operand.vmem [shape: f32[2,32,256], index: 0, kind: input, shape index: {}, may-alias: {0,3}]   ;;  %s697_s1 = inlined_call_operand.vmem [shape: f32[32,2], index: 1, kind: input, shape index: {}]   ;;  %s698_s2 = inlined_call_operand.vmem [shape: f32[2,32], index: 2, kind: input, shape index: {}]   ;;  %s699_s3 = inlined_call_operand.vmem [shape: f32[2,32,256], index: 3, kind: output, shape index: {}, may-alias: {0,3}]  }
   0x1 LB: > { %s523_s13 = sadd.s32 4294967295, %s590_s12   ;;  %p527_p0 = scmp.ge.s32.totalorder %s590_s12, 1  ;;  %s590_s12 = sphi %s615_s12, %s13_s12  }
   0x2   : > { %p137_p1 = scmp.lt.s32.totalorder %s590_s12, 3 }
   0x4   : > { %p138_p2 = pnand %p527_p0, %p137_p1 }
   0x5   : > { %p161_p3 = scmp.lt.s32.totalorder (!%p138_p2), %s523_s13, 1  ;;  %v265_v16 = vld [vmem:[%s697_s1] sm:$0xff] (!%p138_p2)  ;;  %v266_v17 = vld [vmem:[%s697_s1 + $0x8] sm:$0xff] (!%p138_p2)  ;;  %v592_v19 = vmov (!%p138_p2), 0.0|0.0   ;;  %v267_v20 = vld [vmem:[%s697_s1 + $0x10] sm:$0xff] (!%p138_p2)  ;;  %vm593_vm0 = vmmov (!%p138_p2), 0   ;;  %v211_v24 = vlaneseq (!%p138_p2) }
   0x6   : > { %141 = sbr.rel (%p138_p2) target bundleno = 763 (0x2fb), region = 32  ;;  %v564_v18 = vpack.c.bf16 (!%p138_p2), %v266_v17, %v265_v16  ;;  %563 = vmatprep.subr.bf16.mxu0 (!%p138_p2), %v592_v19  ;;  %v268_v21 = vld [vmem:[%s697_s1 + $0x18] sm:$0xff] (!%p138_p2)  ;;  %v594_v23 = vmov (!%p138_p2), 0.0   ;;  %vm222_vm1 = vcmask (!%p138_p2), 130112   ;;  %vm229_vm2 = vcmask (!%p138_p2), 195712  }
   0x7   : > { %v567_v22 = vpack.c.bf16 (!%p138_p2), %v268_v21, %v267_v20  ;;  %555 = vmatprep.mubr.msk.f32.mxu0 (!%p138_p2), %vm593_vm0, %v594_v23  ;;  %558 = vmatprep.subr.mxu1 (!%p138_p2), %v594_v23  ;;  %v212_v25 = vand.u32 (!%p138_p2), 127, %v211_v24  ;;  %v214_v28 = vshrl.u32 (!%p138_p2), %v211_v24, 7  ;;  %vm236_vm3 = vcmask (!%p138_p2), 261312   ;;  %v344_v61 = vld [vmem:[%s698_s2] sm:$0x3] (!%p138_p2) }
   0x8   : > { %565 = vmatpush3.bf16.msra.mxu0 (!%p138_p2), %v564_v18  ;;  %560 = vmatprep.mubr.msk.f32.mxu1 (!%p138_p2), %vm593_vm0, %v594_v23  ;;  %vm263_vm4 = vcmask (!%p138_p2), 1040384   ;;  %vm269_vm5 = vcmask (!%p138_p2), 261120   ;;  %vm349_vm6 = vcmask (!%p138_p2), 1041408   ;;  %vm345_vm7 = vcmask (!%p138_p2), 15360  }
   0x9   : > { %566 = vmatprep.subr.bf16.mxu0 (!%p138_p2), %v592_v19  ;;  %v217_v27 = vadd.s32 (!%p138_p2), 4294967288, %v212_v25  ;;  %v224_v30 = vadd.s32 (!%p138_p2), 4294967280, %v212_v25  ;;  %v215_v33 = vsub.s32 (!%p138_p2), %v212_v25, %v214_v28  ;;  %v231_v35 = vadd.s32 (!%p138_p2), 4294967272, %v212_v25  ;;  %559 = vmatpush3.msk.msra.mxu1 (!%p138_p2), %vm349_vm6, %v344_v61 }
   0xa   : > { %v435_v16 = vsub.s32 (!%p138_p2), 0, %v214_v28 }
   0xb   : > { %v220_v32 = vsub.s32 (!%p138_p2), %v217_v27, %v214_v28  ;;  %v227_v38 = vsub.s32 (!%p138_p2), %v224_v30, %v214_v28  ;;  %v234_v43 = vsub.s32 (!%p138_p2), %v231_v35, %v214_v28 }
   0xc   : > { %568 = vmatpush3.bf16.msra.mxu0 (!%p138_p2), %v567_v22 }
   0xd   : > { %s701_s13 = smov (!%p161_p3, %s523_s13), 1 }
   0xe   : > { %s538_s14 = sshll.u32 %s701_s13, 6 }
   0xf   : > { %s165_s17 = scalar_lea.vmem %s696_s0, %s538_s14  ;;  %s170_s30 = scalar_lea.vmem %s699_s3, %s538_s14 }
  0x10   : > { %v631_v0 = vld [vmem:[%s165_s17 + $0x20] sm:$0xff]  ;;  %v633_v1 = vld [vmem:[%s165_s17 + $0x28] sm:$0xff]  ;;  %v641_v5 = vld [vmem:[%s165_s17 + $0x30] sm:$0xff] }
  0x11   : > { %v635_v2 = vld [vmem:[%s165_s17] sm:$0xff]  ;;  %v185_v3 = vadd.f32 %v633_v1, %v631_v0  ;;  %v639_v4 = vld [vmem:[%s165_s17 + $0x8] sm:$0xff]  ;;  %v643_v6 = vld [vmem:[%s165_s17 + $0x38] sm:$0xff]  ;;  %v201_v15 = vmax.f32 %v631_v0, %v633_v1 }
  0x12   : > { %v179_v7 = vadd.f32 %v639_v4, %v635_v2  ;;  %v647_v8 = vld [vmem:[%s165_s17 + $0x10] sm:$0xff]  ;;  %v649_v9 = vld [vmem:[%s165_s17 + $0x18] sm:$0xff]  ;;  %v188_v10 = vadd.f32 %v643_v6, %v641_v5  ;;  %v195_v13 = vmax.f32 %v635_v2, %v639_v4  ;;  %v204_v14 = vmax.f32 %v641_v5, %v643_v6 }
  0x13   : > { %186 = vadd.xlane.f32.xlu1 %v185_v3  ;;  %v182_v11 = vadd.f32 %v649_v9, %v647_v8  ;;  %v198_v12 = vmax.f32 %v647_v8, %v649_v9 }
  0x14   : > { %180 = vadd.xlane.f32.xlu0 %v179_v7 }
  0x17   : > { %189 = vadd.xlane.f32.xlu1 %v188_v10 }
  0x18   : > { %183 = vadd.xlane.f32.xlu0 %v182_v11 }
  0x1b   : > { %199 = vmax.xlane.f32.xlu1 %v198_v12 }
  0x1c   : > { %196 = vmax.xlane.f32.xlu0 %v195_v13 }
  0x1f   : > { %205 = vmax.xlane.f32.xlu1 %v204_v14 }
  0x20   : > { %202 = vmax.xlane.f32.xlu0 %v201_v15 }
  0xa0   : > { %v187_v26 = vpop.xlane.xlu1 %186 }
  0xa1   : > { %v181_v29 = vpop.xlane.xlu0 %180  ;;  %v193_v39 = vmul.f32 0.00390625, %v187_v26 }
  0xa2   : > { %v191_v34 = vmul.f32 0.00390625, %v181_v29 }
  0xa3   : > { %v228_v49 = vrot.slane %v193_v39, %v227_v38 }
  0xa4   : > { %v190_v31 = vpop.xlane.xlu1 %189  ;;  %v216_v42 = vrot.slane %v191_v34, %v215_v33 }
  0xa5   : > { %v184_v36 = vpop.xlane.xlu0 %183  ;;  %v194_v44 = vmul.f32 0.00390625, %v190_v31 }
  0xa6   : > { %v192_v37 = vmul.f32 0.00390625, %v184_v36 }
  0xa7   : > { %v235_v51 = vrot.slane %v194_v44, %v234_v43 }
  0xa8   : > { %v221_v40 = vrot.slane %v192_v37, %v220_v32  ;;  %v200_v41 = vpop.xlane.xlu1 %199 }
  0xa9   : > { %v197_v45 = vpop.xlane.xlu0 %196  ;;  %v250_v47 = vrot.slane %v200_v41, %v220_v32 }
  0xaa   : > { %v223_v46 = vsel %vm222_vm1, %v221_v40, %v216_v42  ;;  %v246_v48 = vrot.slane %v197_v45, %v215_v33 }
  0xab   : > { %v230_v55 = vsel %vm229_vm2, %v228_v49, %v223_v46 }
  0xac   : > { %v206_v50 = vpop.xlane.xlu1 %205  ;;  %v251_v56 = vsel %vm222_vm1, %v250_v47, %v246_v48  ;;  %v237_v59 = vsel %vm236_vm3, %v235_v51, %v230_v55 }
  0xad   : > { %v203_v52 = vpop.xlane.xlu0 %202  ;;  %v260_v53 = vrot.slane %v206_v50, %v234_v43 }
  0xae   : > { %v255_v54 = vrot.slane %v203_v52, %v227_v38 }
  0xb0   : > { %v256_v57 = vsel %vm229_vm2, %v255_v54, %v251_v56 }
  0xb1   : > { %v261_v58 = vsel %vm236_vm3, %v260_v53, %v256_v57 }
  0xb2   : > { %v264_v60 = vsel %vm263_vm4, %v237_v59, %v261_v58 }
  0xb3   : > { %556 = vmatmul.mubr.msk.f32.vlgmr.msra.gmra.mrb[0].mxu0 %vm269_vm5, %v264_v60 }
 0x186   : > { %v339_v62 = vpop.f32.mrb[0].mxu0 }
 0x187   : > { %v343_v63 = vmax.f32 %v339_v62, 0.0  ;;  %v557_v3 = vpop.f32.mrb[1].mxu0 }
 0x189   : > { %561 = vmatmul.mubr.msk.f32.vlgmr.msra.gmra.mrb[0].mxu1 %vm345_vm7, %v343_v63 }
 0x25c   : > { %v419_v7 = vpop.f32.mrb[0].mxu1 }
 0x25d   : > { %v424_v10 = vrot.slane %v419_v7, 1  ;;  %v562_v11 = vpop.f32.mrb[1].mxu1 }
 0x25f   : > { %v426_v12 = vadd.f32 %v424_v10, %v419_v7 }
 0x261   : > { %v535_v13 = vmul.f32 -1.442695, %v426_v12 }
 0x263   : > { %580 = vpow2.f32 %v535_v13 }
 0x26d   : > { %v581_v14 = vpop.eup %580 }
 0x26e   : > { %v430_v15 = vadd.f32 1.0, %v581_v14 }
 0x270   : > { %582 = vrcp.f32 %v430_v15 }
 0x27a   : > { %v583_v17 = vpop.eup %582 }
 0x27b   : > { %v436_v18 = vrot.slane %v583_v17, %v435_v16 }
 0x27d   : > { %442 = vbcast.lane.b32.xlu1 %v436_v18, 264  ;;  %438 = vbcast.lane.b32.xlu0 %v436_v18, 256 }
 0x281   : > { %446 = vbcast.lane.b32.xlu1 %v436_v18, 272 }
 0x285   : > { %450 = vbcast.lane.b32.xlu1 %v436_v18, 280 }
 0x2ef   : > { %v443_v19 = vpop.permute.xlu1 %442  ;;  %v439_v20 = vpop.permute.xlu0 %438 }
 0x2f0   : > { %v454_v21 = vmul.f32 %v443_v19, %v647_v8  ;;  %v455_v22 = vmul.f32 %v443_v19, %v649_v9  ;;  %v452_v23 = vmul.f32 %v439_v20, %v635_v2  ;;  %v453_v24 = vmul.f32 %v439_v20, %v639_v4 }
 0x2f2   : > { %462 = vst [vmem:[%s170_s30 + $0x10] sm:$0xff] %v454_v21  ;;  %463 = vst [vmem:[%s170_s30 + $0x18] sm:$0xff] %v455_v22 }
 0x2f3   : > { %460 = vst [vmem:[%s170_s30] sm:$0xff] %v452_v23  ;;  %461 = vst [vmem:[%s170_s30 + $0x8] sm:$0xff] %v453_v24  ;;  %v447_v25 = vpop.permute.xlu1 %446 }
 0x2f4   : > { %v456_v26 = vmul.f32 %v447_v25, %v631_v0  ;;  %v457_v27 = vmul.f32 %v447_v25, %v633_v1 }
 0x2f6   : > { %464 = vst [vmem:[%s170_s30 + $0x20] sm:$0xff] %v456_v26  ;;  %465 = vst [vmem:[%s170_s30 + $0x28] sm:$0xff] %v457_v27 }
 0x2f7   : > { %v451_v28 = vpop.permute.xlu1 %450 }
 0x2f8   : > { %v458_v8 = vmul.f32 %v451_v28, %v641_v5  ;;  %v459_v9 = vmul.f32 %v451_v28, %v643_v6 }
 0x2fa   : > { %466 = vst [vmem:[%s170_s30 + $0x30] sm:$0xff] %v458_v8  ;;  %467 = vst [vmem:[%s170_s30 + $0x38] sm:$0xff] %v459_v9 }
 0x2fb PF: > { %s13_s12 = sadd.s32 1, %s590_s12  }
 0x2fc   : > { %p10_p4 = scmp.ge.s32.totalorder %s13_s12, 4  }
 0x2fe   :  { %12 = sbr.rel (!%p10_p4) target bundleno = 1 (0x1), region = 62 }

</bundles_post_ra>
